<compile_context>
chip_gen: v7x
topology: tpu7x:2x2x1
jax: 0.10.0
libtpu: 0.0.40
codegen_flags: <defaults>
</compile_context>

<pallas_src>
import functools

import jax
import jax.numpy as jnp
from jax.experimental import pallas as pl
from jax.experimental.pallas import tpu as pltpu


def _round_up(x, m):
    return (x + m - 1) // m * m


def _preferred_desc_dtype():
    """int8 on v5e/v6e (native i8 MXU), bf16 otherwise (exact for {0,1} bits)."""
    try:
        kind = jax.devices()[0].device_kind.lower()
    except Exception:
        return jnp.bfloat16
    if ("v5e" in kind) or ("v5 lite" in kind) or ("v5lite" in kind) or ("v6" in kind):
        return jnp.int8
    # TODO(synk): fp8 e4m3 descriptors on v7x (0/+-1 exactly representable, f32 acc).
    return jnp.bfloat16


def _bf_match_kernel(col_ref, desc_n_ref, desc_r_ref, idx_ref, *, p):
    """One (batch, query-tile) block: Hamming argmin of desc_n rows vs all desc_r rows.

    col_ref   : (1, Nr_pad)      int32/f32 column index (BIG sentinel on padded cols)
    desc_n_ref: (TILE_Q, D)      int8/bf16, bits in {0,1}   (query descriptors, img_n)
    desc_r_ref: (Nr_pad, D)      int8/bf16, bits in {0,1}   (train descriptors, img_r)
    idx_ref   : (1, TILE_Q)      int32  trainIdx of best match per query

    +/-1 trick: <1-2*dn[q], dr[t]> = Hamming(q,t) - |dn[q]|  -> same argmin over t.
    Packed key = ham * P + col (P = next_power_of_2(Nr_pad)); one lane-axis min, decode
    with key & (P-1) (floor-mod, correct for negative keys).  Lowest-trainIdx tie-break
    is preserved by construction.
    """
    tq = desc_n_ref.shape[0]
    dims = (((1,), (1,)), ((), ()))

    if jnp.issubdtype(desc_n_ref.dtype, jnp.integer):
        # int8 MXU path (v5e/v6e): exact i32 accumulation.
        dn_pm = 1 - 2 * desc_n_ref[...]                              # int8 {-1,+1}
        ham = jax.lax.dot_general(dn_pm, desc_r_ref[...], dims,
                                  preferred_element_type=jnp.int32)  # (tq, Nr_pad)
        key = ham * jnp.int32(p) + col_ref[...]                      # int32
        min_key = jnp.min(key, axis=-1)                              # (tq,)
    else:
        # bf16/f32 path: fold the power-of-two scale P into dn_pm (exact), so the key
        # is a single VPU add of the precomputed column row onto the MXU output.
        scale = jnp.asarray(p, dtype=desc_n_ref.dtype)
        dn_pm = scale - (2 * scale) * desc_n_ref[...]                # {+P, -P}, exact
        ham = jax.lax.dot_general(dn_pm, desc_r_ref[...], dims,
                                  preferred_element_type=jnp.float32)
        key = ham + col_ref[...]                                     # exact ints in f32
        min_key = jnp.min(key, axis=-1).astype(jnp.int32)            # (tq,)

    idx_ref[...] = (min_key & (p - 1)).reshape(1, tq)


def bf_match(desc_n, desc_r):
    """Batched brute-force Hamming matcher (cv2.BFMatcher.match semantics).

    desc_n: (B, Nn, D) query descriptors (img_n), bits {0,1}, dtype int8/bf16/f32
    desc_r: (B, Nr, D) train descriptors (img_r), bits {0,1}, same dtype
    returns: (B, Nn) int32 trainIdx per query (lowest trainIdx on ties)
    """
    B, Nn, D = desc_n.shape
    _, Nr, _ = desc_r.shape

    lane = 128
    Nn_pad = _round_up(Nn, lane)
    Nr_pad = _round_up(Nr, lane)
    Dp = _round_up(D, lane)

    P = max(pl.next_power_of_2(Nr_pad), 2)
    # Packed-key exactness (f32 path) and BIG-sentinel headroom: (D+2)*P must stay an
    # exact f32 integer.  Beyond this, tile Nr (see TODO at top of file).
    assert (D + 2) * P < (1 << 24), "Nr too large for exact packed-key argmin"

    if (Nn_pad, Dp) != (Nn, D):
        desc_n = jnp.pad(desc_n, ((0, 0), (0, Nn_pad - Nn), (0, Dp - D)))
    if (Nr_pad, Dp) != (Nr, D):
        desc_r = jnp.pad(desc_r, ((0, 0), (0, Nr_pad - Nr), (0, Dp - D)))

    use_int = jnp.issubdtype(desc_n.dtype, jnp.integer)
    col_dtype = jnp.int32 if use_int else jnp.float32
    big = (D + 2) * P  # larger than any real key (max real key < (D+1)*P)
    cols = jnp.arange(Nr_pad, dtype=jnp.int32)
    col = jnp.where(cols < Nr, cols, big).astype(col_dtype).reshape(1, Nr_pad)

    # Query tile: as large as comfortably fits (amortize ~0.35us/step overhead).
    if Nn_pad <= 1024:
        tile_q = Nn_pad
    else:
        tile_q = next(c for c in (512, 256, 128) if Nn_pad % c == 0)
    # Keep both v7x TensorCores busy: avoid a single-step grid when splittable.
    if B * (Nn_pad // tile_q) < 2 and Nn_pad % 256 == 0:
        tile_q = Nn_pad // 2
    grid = (B, Nn_pad // tile_q)  # q innermost -> desc_r block reused across q steps

    itemsize = jnp.dtype(desc_n.dtype).itemsize
    vmem_bytes = (
        2 * (tile_q + Nr_pad) * Dp * itemsize   # double-buffered descriptor blocks
        + 2 * tile_q * 4                        # double-buffered (1, tile_q) i32 output
        + Nr_pad * 4                            # column-index row
        + 3 * tile_q * Nr_pad * 4               # ham / key slabs + headroom
        + (2 << 20)
    )
    vmem_limit = int(min(max(vmem_bytes, 32 << 20), 64 << 20))

    cost = pl.CostEstimate(
        flops=2 * B * Nn_pad * Nr_pad * Dp,
        transcendentals=0,
        bytes_accessed=(B * (Nn_pad + Nr_pad) * Dp * itemsize
                        + B * Nn_pad * 4 + Nr_pad * 4),
    )

    out = pl.pallas_call(
        functools.partial(_bf_match_kernel, p=P),
        out_shape=jax.ShapeDtypeStruct((B, 1, Nn_pad), jnp.int32),
        grid_spec=pltpu.PrefetchScalarGridSpec(
            num_scalar_prefetch=0,
            grid=grid,
            in_specs=[
                pl.BlockSpec((1, Nr_pad), lambda b, q: (0, 0)),           # col (reused)
                pl.BlockSpec((None, tile_q, Dp), lambda b, q: (b, q, 0)),  # desc_n tile
                pl.BlockSpec((None, Nr_pad, Dp), lambda b, q: (b, 0, 0)),  # desc_r full
            ],
            out_specs=pl.BlockSpec((None, 1, tile_q), lambda b, q: (b, 0, q)),
        ),
        compiler_params=pltpu.CompilerParams(
            dimension_semantics=("parallel", "parallel"),
            vmem_limit_bytes=vmem_limit,
        ),
        cost_estimate=cost,
    )(col, desc_n, desc_r)
    return out[:, 0, :Nn]  # (B, Nn)


@functools.partial(jax.jit, static_argnames=("nfeatures",))
def _match_and_gather(desc_n, desc_r, kp_r, kp_n, nfeatures):
    """Fused Pallas match + coordinate gather + NaN padding (all on device)."""
    train_idx = bf_match(desc_n, desc_r)                                   # (B, Nn)
    B, Nn = train_idx.shape
    kp_r_matched = jnp.take_along_axis(kp_r, train_idx[..., None], axis=1)  # (B, Nn, 2)
    kp_n_matched = kp_n[:, :Nn, :]                                          # queryIdx == arange
    valid_corr = jnp.concatenate([kp_r_matched, kp_n_matched],
                                 axis=-1).astype(jnp.float32)               # (B, Nn, 4)
    pad = nfeatures - Nn
    if pad > 0:
        xy = jnp.pad(valid_corr, ((0, 0), (0, pad), (0, 0)),
                     constant_values=jnp.nan)
    else:
        xy = valid_corr[:, :nfeatures]
    return train_idx, xy


def orb_matcher_forward(img_r, img_n, kp_r, kp_n, desc_r, desc_n,
                        nfeatures, apply_mask=True, ransac_tol=-1):
    """Mirrors ORBMatcher.forward given (synthetic) detection outputs.

    img_r, img_n   : (B, 3, H, W) placeholders (NCHW, like the PyTorch module)
    kp_r, kp_n     : (B, N, 2) keypoint xy coordinates
    desc_r, desc_n : (B, N, 256) descriptor bits in {0,1}
    """
    del img_r, img_n  # only consumed by cv2 detection in the original module
    B, Nn, _ = desc_n.shape

    dt = _preferred_desc_dtype()
    train_idx, xy_rn_matched = _match_and_gather(
        desc_n.astype(dt), desc_r.astype(dt), kp_r, kp_n, nfeatures)
    query_idx = jnp.broadcast_to(jnp.arange(Nn, dtype=jnp.int32), (B, Nn))

    # TODO(synk): cv2.findHomography(RANSAC) has no Pallas equivalent; with the default
    # ransac_tol=-1 the mask is a constant all-True, so masked == unmasked below.
    match_indices = []
    n_corrs = []
    for i in range(B):
        match_idx = jnp.stack([train_idx[i], query_idx[i]], axis=-1)  # (Nn, 2)
        match_indices.append(match_idx)   # masked (mask all-True) or unmasked
        match_indices.append(match_idx)   # reference module appends the full set again
        n_corrs.append(Nn)

    return match_indices, xy_rn_matched, n_corrs, [None for _ in range(B)]


if __name__ == "__main__":
    key = jax.random.PRNGKey(0)

    B = 2
    H = W = 16
    nfeatures = 64       # small stand-in for the default 500
    N = 64               # number of detected keypoints per image (== nfeatures cap)
    DBITS = 256          # ORB descriptor = 32 bytes = 256 bits

    k_img_r, k_img_n, k_kp_r, k_kp_n, k_d_r, k_d_n = jax.random.split(key, 6)

    # placeholder images, NCHW like the torch module (only consumed by cv2 in the
    # original; detection here is synthetic)
    img_r = jax.random.uniform(k_img_r, (B, 3, H, W), dtype=jnp.float32)
    img_n = jax.random.uniform(k_img_n, (B, 3, H, W), dtype=jnp.float32)

    # synthetic ORB outputs: keypoint xy coords + binary descriptor bits {0,1}
    kp_r = jax.random.uniform(k_kp_r, (B, N, 2), dtype=jnp.float32) * (W - 1)
    kp_n = jax.random.uniform(k_kp_n, (B, N, 2), dtype=jnp.float32) * (W - 1)
    desc_r = jax.random.bernoulli(k_d_r, 0.5, (B, N, DBITS)).astype(jnp.float32)
    desc_n = jax.random.bernoulli(k_d_n, 0.5, (B, N, DBITS)).astype(jnp.float32)

    match_indices, xy_rn_matched, n_corrs, extras = orb_matcher_forward(
        img_r, img_n, kp_r, kp_n, desc_r, desc_n,
        nfeatures=nfeatures, apply_mask=True, ransac_tol=-1,
    )

    jax.block_until_ready(xy_rn_matched)
    for m in match_indices:
        jax.block_until_ready(m)

    # sanity: shapes match the module contract
    assert xy_rn_matched.shape == (B, nfeatures, 4)
    assert len(match_indices) == 2 * B
    assert n_corrs == [N] * B
    assert extras == [None] * B

    # cross-check the Pallas matcher (in whichever dtype path this chip uses) against a
    # pure-JAX reference (exact: all values are small integers)
    dt = _preferred_desc_dtype()
    got_idx = bf_match(desc_n.astype(dt), desc_r.astype(dt))
    jax.block_until_ready(got_idx)

    ham_ref = (
        desc_n.sum(-1)[:, :, None]
        + desc_r.sum(-1)[:, None, :]
        - 2.0 * jnp.einsum("bqd,btd->bqt", desc_n, desc_r)
    )
    ref_idx = jnp.argmin(ham_ref, axis=-1).astype(jnp.int32)
    assert bool(jnp.all(ref_idx == got_idx))
    assert bool(jnp.all(got_idx >= 0)) and bool(jnp.all(got_idx < N))

    print("KERNEL_OK")
</pallas_src>

<mosaic_0001>
module attributes {stable_mosaic.version = 11 : i64} {
  func.func @_bf_match_kernel(%arg0: i32, %arg1: i32, %arg2: memref<1x128xf32, #tpu.memory_space<vmem>>, %arg3: memref<1x128x256xbf16, #tpu.memory_space<vmem>>, %arg4: memref<1x128x256xbf16, #tpu.memory_space<vmem>>, %arg5: memref<1x1x128xi32, #tpu.memory_space<vmem>>) attributes {dimension_semantics = [#tpu.dimension_semantics<parallel>, #tpu.dimension_semantics<parallel>], iteration_bounds = array<i64: 2, 1>, scalar_prefetch = 0 : i64, scratch_operands = 0 : i64, tpu.core_type = #tpu.core_type<tc>, window_params = [{pipeline_mode = #tpu.pipeline_mode<synchronous>, transform_indices = @transform_0, window_bounds = array<i64: 1, 128>}, {transform_indices = @transform_1, window_bounds = array<i64: 1, 128, 256>}, {transform_indices = @transform_2, window_bounds = array<i64: 1, 128, 256>}, {transform_indices = @transform_3, window_bounds = array<i64: 1, 1, 128>}]} {
    %cst = arith.constant 2.000000e+00 : bf16
    %cst_0 = arith.constant 1.280000e+02 : bf16
    %0 = arith.mulf %cst, %cst_0 : bf16
    %c0 = arith.constant 0 : index
    %c0_1 = arith.constant 0 : index
    %c0_2 = arith.constant 0 : index
    %1 = vector.load %arg3[%c0, %c0_1, %c0_2] : memref<1x128x256xbf16, #tpu.memory_space<vmem>>, vector<1x128x256xbf16>
    %2 = vector.shape_cast %1 : vector<1x128x256xbf16> to vector<128x256xbf16>
    %3 = vector.broadcast %0 : bf16 to vector<128x256xbf16>
    %4 = arith.mulf %3, %2 : vector<128x256xbf16>
    %cst_3 = arith.constant 1.280000e+02 : bf16
    %5 = vector.broadcast %cst_3 : bf16 to vector<128x256xbf16>
    %6 = arith.subf %5, %4 : vector<128x256xbf16>
    %c0_4 = arith.constant 0 : index
    %c0_5 = arith.constant 0 : index
    %c0_6 = arith.constant 0 : index
    %7 = vector.load %arg4[%c0_4, %c0_5, %c0_6] : memref<1x128x256xbf16, #tpu.memory_space<vmem>>, vector<1x128x256xbf16>
    %8 = vector.shape_cast %7 : vector<1x128x256xbf16> to vector<128x256xbf16>
    %cst_7 = arith.constant dense<0.000000e+00> : vector<128x128xf32>
    %9 = tpu.matmul %6, %8, %cst_7 {dimension_numbers = #tpu.dot_dimension_numbers<[1], [1], [0], [0], [0, 0, 1, 0], [], []>} : vector<128x256xbf16>, vector<128x256xbf16>, vector<128x128xf32> -> vector<128x128xf32>
    %c0_8 = arith.constant 0 : index
    %c0_9 = arith.constant 0 : index
    %10 = vector.load %arg2[%c0_8, %c0_9] : memref<1x128xf32, #tpu.memory_space<vmem>>, vector<1x128xf32>
    %11 = vector.broadcast %10 : vector<1x128xf32> to vector<128x128xf32>
    %12 = arith.addf %9, %11 : vector<128x128xf32>
    %cst_10 = arith.constant dense<0x7F800000> : vector<128xf32>
    %13 = vector.multi_reduction <minimumf>, %12, %cst_10 [1] : vector<128x128xf32> to vector<128xf32>
    %14 = arith.fptosi %13 : vector<128xf32> to vector<128xi32>
    %c127_i32 = arith.constant 127 : i32
    %15 = vector.broadcast %c127_i32 : i32 to vector<128xi32>
    %16 = arith.andi %14, %15 : vector<128xi32>
    %17 = vector.shape_cast %16 : vector<128xi32> to vector<1x128xi32>
    %c0_11 = arith.constant 0 : index
    %c0_12 = arith.constant 0 : index
    %c0_13 = arith.constant 0 : index
    %18 = vector.load %arg5[%c0_11, %c0_12, %c0_13] : memref<1x1x128xi32, #tpu.memory_space<vmem>>, vector<1x1x128xi32>
    %19 = vector.shape_cast %18 : vector<1x1x128xi32> to vector<1x128xi32>
    %20 = vector.shape_cast %17 : vector<1x128xi32> to vector<1x1x128xi32>
    tpu.vector_store %arg5[%c0_11, %c0_12, %c0_13], %20 {strides = array<i32>} : memref<1x1x128xi32, #tpu.memory_space<vmem>>, vector<1x1x128xi32>,
    return
  }
  func.func @transform_0(%arg0: i32, %arg1: i32) -> (i32, i32) {
    %c0_i32 = arith.constant 0 : i32
    %c0_i32_0 = arith.constant 0 : i32
    %c0_i32_1 = arith.constant 0 : i32
    return %c0_i32, %c0_i32_0 : i32, i32
  }
  func.func @transform_1(%arg0: i32, %arg1: i32) -> (i32, i32, i32) {
    %c0_i32 = arith.constant 0 : i32
    %c0_i32_0 = arith.constant 0 : i32
    return %arg0, %arg1, %c0_i32 : i32, i32, i32
  }
  func.func @transform_2(%arg0: i32, %arg1: i32) -> (i32, i32, i32) {
    %c0_i32 = arith.constant 0 : i32
    %c0_i32_0 = arith.constant 0 : i32
    %c0_i32_1 = arith.constant 0 : i32
    return %arg0, %c0_i32, %c0_i32_0 : i32, i32, i32
  }
  func.func @transform_3(%arg0: i32, %arg1: i32) -> (i32, i32, i32) {
    %c0_i32 = arith.constant 0 : i32
    %c0_i32_0 = arith.constant 0 : i32
    return %arg0, %c0_i32, %arg1 : i32, i32, i32
  }
}

</mosaic_0001>

<bundles_post_ra>
// kernel: _match_and_gather.1
= control target key start
LH: loop header
LB: loop body
LE: loop exit
PB: predicated region body
PF: predicated region fallthrough
CT: control target
= control target key end

     0   :  { %s1005_s12 = smov 0   ;;  %s1007_s13 = smov 0   ;;  %s1192_s0 = inlined_call_operand.vmem [shape: f32[1,128], index: 0, kind: input, shape index: {}]   ;;  %s1193_s1 = inlined_call_operand.vmem [shape: bf16[2,128,256], index: 1, kind: input, shape index: {}]   ;;  %s1194_s2 = inlined_call_operand.vmem [shape: bf16[2,128,256], index: 2, kind: input, shape index: {}]   ;;  %s1195_s3 = inlined_call_operand.vmem [shape: s32[2,1,128], index: 3, kind: output, shape index: {}]  }
   0x1   :  { %s1009_s14 = smov 0  }
   0x2 LB: > { %s25_s15 = sadd.s32 1, %s979_s13  ;;  %p823_p0 = scmp.ge.s32.totalorder %s983_s14, 1  ;;  %s983_s14 = sphi %s1009_s14, %s13_s14   ;;  %s979_s13 = sphi %s1007_s13, %s1197_s13   ;;  %s975_s12 = sphi %s1005_s12, %s1196_s12  }
   0x3   : > { %p27_p1 = scmp.ge.s32.totalorder %s25_s15, 2  ;;  %p169_p2 = scmp.lt.s32.totalorder %s983_s14, 3 }
   0x5   : > { %s1199_s15 = smov (%p27_p1, %s25_s15), 0  ;;  %p170_p3 = pnand %p823_p0, %p169_p2 }
   0x6   : > { %p205_p4 = scmp.lt.s32.totalorder (!%p170_p3), %s975_s12, 1  ;;  %vm632_vm0 = vcmask (!%p170_p3), 130112   ;;  %vm639_vm1 = vcmask (!%p170_p3), 195712   ;;  %vm646_vm2 = vcmask (!%p170_p3), 261312   ;;  %vm653_vm3 = vcmask (!%p170_p3), 326912  }
   0x7   : > { %173 = sbr.rel (%p170_p3) target bundleno = 482 (0x1e2), region = 32  ;;  %vm660_vm4 = vcmask (!%p170_p3), 392512   ;;  %vm667_vm5 = vcmask (!%p170_p3), 458112   ;;  %vm674_vm6 = vcmask (!%p170_p3), 523712   ;;  %vm681_vm7 = vcmask (!%p170_p3), 589312  }
   0x8   : > { %vm688_vm8 = vcmask (!%p170_p3), 654912   ;;  %vm695_vm9 = vcmask (!%p170_p3), 720512   ;;  %vm702_vm10 = vcmask (!%p170_p3), 786112   ;;  %vm709_vm11 = vcmask (!%p170_p3), 851712  }
   0x9   : > { %vm716_vm12 = vcmask (!%p170_p3), 917312   ;;  %vm723_vm13 = vcmask (!%p170_p3), 982912   ;;  %vm730_vm14 = vcmask (!%p170_p3), 1048512  }
   0xe   : > { %s1201_s12 = smov (!%p205_p4, %s975_s12), 1 }
   0xf   : > { %s863_s16 = sshll.u32 %s1201_s12, 7  ;;  %s225_s27 = scalar_lea.vmem %s1195_s3, %s1201_s12 }
  0x10   : > { %s1029_s19 = scalar_lea.vmem %s1194_s2, %s863_s16  ;;  %s1038_s22 = scalar_lea.vmem %s1193_s1, %s863_s16 }
  0x11   : > { %v937_v0 = vld [vmem:[%s1029_s19 + $0x4] ss:$8 sps:$4 sm:$0xff]   ;;  %v939_v1 = vld [vmem:[%s1029_s19] ss:$8 sps:$4 sm:$0xff]   ;;  %v940_v2 = vld [vmem:[%s1029_s19 + $0x14] ss:$8 sps:$4 sm:$0xff]  }
  0x12   : > { %460 = vmatprep.subr.bf16.mxu0 %v937_v0  ;;  %865 = vmatprep.subr.bf16.mxu1 %v937_v0  ;;  %v942_v3 = vld [vmem:[%s1029_s19 + $0x10] ss:$8 sps:$4 sm:$0xff]   ;;  %v943_v4 = vld [vmem:[%s1029_s19 + $0x24] ss:$8 sps:$4 sm:$0xff]   ;;  %v945_v17 = vld [vmem:[%s1029_s19 + $0x20] ss:$8 sps:$4 sm:$0xff]  }
  0x13   : > { %461 = vmatpush1.bf16.xpose.msra.mxu0 %v939_v1  ;;  %873 = vmatpush1.bf16.xpose.msra.mxu1 %v939_v1  ;;  %v229_v5 = vld [vmem:[%s1038_s22] sm:$0xff]  ;;  %v230_v6 = vld [vmem:[%s1038_s22 + $0x8] sm:$0xff]  ;;  %v946_v18 = vld [vmem:[%s1029_s19 + $0x34] ss:$8 sps:$4 sm:$0xff]  }
  0x14   : > { %462 = vmatprep.subr.bf16.mxu0 %v940_v2  ;;  %866 = vmatprep.subr.bf16.mxu1 %v940_v2  ;;  %v245_v7 = vmul.bf16 1132479360, %v229_v5  ;;  %v237_v8 = vld [vmem:[%s1038_s22 + $0x40] sm:$0xff]  ;;  %v238_v9 = vld [vmem:[%s1038_s22 + $0x48] sm:$0xff]  ;;  %v246_v10 = vmul.bf16 1132479360, %v230_v6 }
  0x15   : > { %v253_v11 = vmul.bf16 1132479360, %v237_v8  ;;  %v254_v12 = vmul.bf16 1132479360, %v238_v9  ;;  %v948_v21 = vld [vmem:[%s1029_s19 + $0x30] ss:$8 sps:$4 sm:$0xff]  }
  0x16   : > { %v1045_v13 = vsub.bf16 1124090624, %v245_v7  ;;  %v1047_v14 = vsub.bf16 1124090624, %v246_v10  ;;  %v949_v22 = vld [vmem:[%s1029_s19 + $0x44] ss:$8 sps:$4 sm:$0xff]  }
  0x17   : > { %v1049_v15 = vsub.bf16 1124090624, %v253_v11  ;;  %v1051_v16 = vsub.bf16 1124090624, %v254_v12  ;;  %v951_v23 = vld [vmem:[%s1029_s19 + $0x40] ss:$8 sps:$4 sm:$0xff]  }
  0x18   : > { %v830_v19 = vcombine.high %v1045_v13, %v1047_v14  ;;  %v952_v24 = vld [vmem:[%s1029_s19 + $0x54] ss:$8 sps:$4 sm:$0xff]   ;;  %v954_v25 = vld [vmem:[%s1029_s19 + $0x50] ss:$8 sps:$4 sm:$0xff]   ;;  %v955_v26 = vld [vmem:[%s1029_s19 + $0x64] ss:$8 sps:$4 sm:$0xff]   ;;  %v829_v46 = vcombine.low %v1045_v13, %v1047_v14 }
  0x19   : > { %v838_v20 = vcombine.high %v1049_v15, %v1051_v16  ;;  %v957_v27 = vld [vmem:[%s1029_s19 + $0x60] ss:$8 sps:$4 sm:$0xff]   ;;  %v958_v28 = vld [vmem:[%s1029_s19 + $0x74] ss:$8 sps:$4 sm:$0xff]   ;;  %v960_v33 = vld [vmem:[%s1029_s19 + $0x70] ss:$8 sps:$4 sm:$0xff]   ;;  %v837_v47 = vcombine.low %v1049_v15, %v1051_v16 }
  0x1a   : > { %492 = vmatprep.mubr.bf16.mxu0 %v830_v19  ;;  %v231_v29 = vld [vmem:[%s1038_s22 + $0x10] sm:$0xff]  ;;  %v232_v30 = vld [vmem:[%s1038_s22 + $0x18] sm:$0xff]  ;;  %v233_v39 = vld [vmem:[%s1038_s22 + $0x20] sm:$0xff] }
  0x1b   : > { %463 = vmatpush1.bf16.xpose.msra.mxu0 %v942_v3  ;;  %874 = vmatpush1.bf16.xpose.msra.mxu1 %v942_v3  ;;  %v239_v31 = vld [vmem:[%s1038_s22 + $0x50] sm:$0xff]  ;;  %v240_v32 = vld [vmem:[%s1038_s22 + $0x58] sm:$0xff]  ;;  %v247_v34 = vmul.bf16 1132479360, %v231_v29  ;;  %v248_v35 = vmul.bf16 1132479360, %v232_v30 }
  0x1c   : > { %464 = vmatprep.subr.bf16.mxu0 %v943_v4  ;;  %867 = vmatprep.subr.bf16.mxu1 %v943_v4  ;;  %v255_v36 = vmul.bf16 1132479360, %v239_v31  ;;  %v256_v37 = vmul.bf16 1132479360, %v240_v32  ;;  %v234_v40 = vld [vmem:[%s1038_s22 + $0x28] sm:$0xff]  ;;  %v241_v44 = vld [vmem:[%s1038_s22 + $0x60] sm:$0xff] }
  0x1d   : > { %524 = vmatprep.mubr.bf16.mxu1 %v838_v20  ;;  %v263_v38 = vsub.bf16 1124090624, %v247_v34  ;;  %v264_v41 = vsub.bf16 1124090624, %v248_v35  ;;  %v242_v45 = vld [vmem:[%s1038_s22 + $0x68] sm:$0xff]  ;;  %v235_v58 = vld [vmem:[%s1038_s22 + $0x30] sm:$0xff] }
  0x1e   : > { %v271_v42 = vsub.bf16 1124090624, %v255_v36  ;;  %v272_v43 = vsub.bf16 1124090624, %v256_v37  ;;  %v249_v48 = vmul.bf16 1132479360, %v233_v39 }
  0x1f   : > { %v250_v49 = vmul.bf16 1132479360, %v234_v40  ;;  %v832_v50 = vcombine.high %v263_v38, %v264_v41  ;;  %v257_v52 = vmul.bf16 1132479360, %v241_v44  ;;  %v258_v53 = vmul.bf16 1132479360, %v242_v45 }
  0x20   : > { %v840_v51 = vcombine.high %v271_v42, %v272_v43  ;;  %v265_v54 = vsub.bf16 1124090624, %v249_v48  ;;  %v236_v59 = vld [vmem:[%s1038_s22 + $0x38] sm:$0xff]  ;;  %v243_v60 = vld [vmem:[%s1038_s22 + $0x70] sm:$0xff]  ;;  %v831_v62 = vcombine.low %v263_v38, %v264_v41  ;;  %v839_v63 = vcombine.low %v271_v42, %v272_v43  ;;  %v828_v16 = vld [vmem:[%s1192_s0] ss:$0 sm:$0xff] }
  0x21   : > { %v266_v55 = vsub.bf16 1124090624, %v250_v49  ;;  %v273_v56 = vsub.bf16 1124090624, %v257_v52  ;;  %v274_v57 = vsub.bf16 1124090624, %v258_v53 }
  0x22   : > { %v244_v61 = vld [vmem:[%s1038_s22 + $0x78] sm:$0xff]  ;;  %v251_v1 = vmul.bf16 1132479360, %v235_v58  ;;  %v252_v3 = vmul.bf16 1132479360, %v236_v59 }
  0x23   : > { %465 = vmatpush1.bf16.xpose.msra.mxu0 %v945_v17  ;;  %875 = vmatpush1.bf16.xpose.msra.mxu1 %v945_v17  ;;  %v834_v0 = vcombine.high %v265_v54, %v266_v55  ;;  %v842_v2 = vcombine.high %v273_v56, %v274_v57  ;;  %v259_v4 = vmul.bf16 1132479360, %v243_v60  ;;  %v260_v5 = vmul.bf16 1132479360, %v244_v61 }
  0x24   : > { %466 = vmatprep.subr.bf16.mxu0 %v946_v18  ;;  %868 = vmatprep.subr.bf16.mxu1 %v946_v18  ;;  %v267_v6 = vsub.bf16 1124090624, %v251_v1  ;;  %v268_v7 = vsub.bf16 1124090624, %v252_v3  ;;  %v833_v10 = vcombine.low %v265_v54, %v266_v55  ;;  %v841_v11 = vcombine.low %v273_v56, %v274_v57 }
  0x25   : > { %v275_v8 = vsub.bf16 1124090624, %v259_v4  ;;  %v276_v9 = vsub.bf16 1124090624, %v260_v5  ;;  %v621_v3 = vlaneseq }
  0x26   : > { %v836_v12 = vcombine.high %v267_v6, %v268_v7  ;;  %v835_v14 = vcombine.low %v267_v6, %v268_v7 }
  0x27   : > { %v844_v13 = vcombine.high %v275_v8, %v276_v9  ;;  %v843_v15 = vcombine.low %v275_v8, %v276_v9  ;;  %v1091_v5 = vand.u32 127, %v621_v3  ;;  %v1093_v8 = vshrl.u32 %v621_v3, 7 }
  0x2b   : > { %467 = vmatpush1.bf16.xpose.msra.mxu0 %v948_v21  ;;  %876 = vmatpush1.bf16.xpose.msra.mxu1 %v948_v21 }
  0x2c   : > { %468 = vmatprep.subr.bf16.mxu0 %v949_v22  ;;  %869 = vmatprep.subr.bf16.mxu1 %v949_v22 }
  0x33   : > { %469 = vmatpush1.bf16.xpose.msra.mxu0 %v951_v23  ;;  %877 = vmatpush1.bf16.xpose.msra.mxu1 %v951_v23 }
  0x34   : > { %470 = vmatprep.subr.bf16.mxu0 %v952_v24  ;;  %870 = vmatprep.subr.bf16.mxu1 %v952_v24 }
  0x3b   : > { %471 = vmatpush1.bf16.xpose.msra.mxu0 %v954_v25  ;;  %878 = vmatpush1.bf16.xpose.msra.mxu1 %v954_v25 }
  0x3c   : > { %472 = vmatprep.subr.bf16.mxu0 %v955_v26  ;;  %871 = vmatprep.subr.bf16.mxu1 %v955_v26 }
  0x43   : > { %473 = vmatpush1.bf16.xpose.msra.mxu0 %v957_v27  ;;  %879 = vmatpush1.bf16.xpose.msra.mxu1 %v957_v27 }
  0x44   : > { %474 = vmatprep.subr.bf16.mxu0 %v958_v28  ;;  %872 = vmatprep.subr.bf16.mxu1 %v958_v28 }
  0x4b   : > { %475 = vmatpush1.bf16.xpose.msra.mxu0 %v960_v33  ;;  %880 = vmatpush1.bf16.xpose.msra.mxu1 %v960_v33 }
  0x52   : > { %493 = vmatmul.mubr.bf16.vlgmr.msra.gmra.mrb[0].mxu0 %v829_v46  ;;  %525 = vmatmul.mubr.bf16.vlgmr.msra.gmra.mrb[0].mxu1 %v837_v47 }
  0x53   : > { %500 = vmatprep.mubr.bf16.mxu0 %v832_v50  ;;  %532 = vmatprep.mubr.bf16.mxu1 %v840_v51 }
  0x5a   : > { %501 = vmatmul.mubr.bf16.gmra.mrb[4].mxu0 %v831_v62  ;;  %533 = vmatmul.mubr.bf16.gmra.mrb[4].mxu1 %v839_v63 }
  0x5b   : > { %508 = vmatprep.mubr.bf16.mxu0 %v834_v0  ;;  %540 = vmatprep.mubr.bf16.mxu1 %v842_v2 }
  0x62   : > { %509 = vmatmul.mubr.bf16.gmra.mrb[8].mxu0 %v833_v10  ;;  %541 = vmatmul.mubr.bf16.gmra.mrb[8].mxu1 %v841_v11  ;;  %v1096_v10 = vadd.s32 4294967224, %v1091_v5  ;;  %v1099_v11 = vadd.s32 4294967232, %v1091_v5 }
  0x63   : > { %516 = vmatprep.mubr.bf16.mxu0 %v836_v12  ;;  %548 = vmatprep.mubr.bf16.mxu1 %v844_v13  ;;  %v634_v13 = vadd.s32 4294967280, %v1091_v5 }
  0x6a   : > { %517 = vmatmul.mubr.bf16.gmra.mrb[12].mxu0 %v835_v14  ;;  %549 = vmatmul.mubr.bf16.gmra.mrb[12].mxu1 %v843_v15  ;;  %v627_v15 = vadd.s32 4294967288, %v1091_v5 }
 0x125   : > { %v494_v17 = vpop.f32.mrb[0].mxu0  ;;  %v526_v18 = vpop.f32.mrb[0].mxu1 }
 0x126   : > { %v496_v19 = vpop.f32.mrb[1].mxu0  ;;  %v528_v20 = vpop.f32.mrb[1].mxu1  ;;  %v495_v21 = vadd.f32 %v828_v16, %v494_v17  ;;  %v527_v24 = vadd.f32 %v828_v16, %v526_v18  ;;  %v625_v18 = vsub.s32 %v1091_v5, %v1093_v8 }
 0x127   : > { %v497_v22 = vpop.f32.mrb[2].mxu0  ;;  %v529_v23 = vpop.f32.mrb[2].mxu1 }
 0x128   : > { %v499_v25 = vpop.f32.mrb[3].mxu0  ;;  %557 = vmin.xlane.f32.xlu0 %v495_v21  ;;  %v531_v26 = vpop.f32.mrb[3].mxu1  ;;  %v530_v27 = vadd.f32 %v828_v16, %v529_v23  ;;  %v498_v30 = vadd.f32 %v828_v16, %v497_v22  ;;  %v686_v21 = vsub.s32 %v1096_v10, %v1093_v8  ;;  %v679_v22 = vsub.s32 %v1099_v11, %v1093_v8 }
 0x129   : > { %v641_v23 = vadd.s32 4294967272, %v1091_v5  ;;  %v637_v26 = vsub.s32 %v634_v13, %v1093_v8 }
 0x12a   : > { %575 = vmin.xlane.f32.xlu1 %v530_v27  ;;  %v1117_v27 = vadd.s32 4294967208, %v1091_v5 }
 0x12c   : > { %573 = vmin.xlane.f32.xlu0 %v527_v24  ;;  %v1113_v24 = vadd.s32 4294967216, %v1091_v5 }
 0x12d   : > { %v502_v28 = vpop.f32.mrb[4].mxu0  ;;  %v534_v29 = vpop.f32.mrb[4].mxu1 }
 0x12e   : > { %v503_v31 = vadd.f32 %v828_v16, %v502_v28  ;;  %v504_v32 = vpop.f32.mrb[5].mxu0  ;;  %v536_v33 = vpop.f32.mrb[5].mxu1  ;;  %v535_v37 = vadd.f32 %v828_v16, %v534_v29  ;;  %v648_v28 = vadd.s32 4294967264, %v1091_v5 }
 0x12f   : > { %v505_v34 = vpop.f32.mrb[6].mxu0  ;;  %v537_v35 = vpop.f32.mrb[6].mxu1  ;;  %v655_v33 = vadd.s32 4294967256, %v1091_v5 }
 0x130   : > { %v507_v36 = vpop.f32.mrb[7].mxu0  ;;  %561 = vmin.xlane.f32.xlu1 %v503_v31  ;;  %559 = vmin.xlane.f32.xlu0 %v498_v30  ;;  %v539_v38 = vpop.f32.mrb[7].mxu1  ;;  %v506_v39 = vadd.f32 %v828_v16, %v505_v34  ;;  %v538_v40 = vadd.f32 %v828_v16, %v537_v35  ;;  %v630_v30 = vsub.s32 %v627_v15, %v1093_v8 }
 0x131   : > { %v1123_v36 = vadd.s32 4294967248, %v1091_v5  ;;  %v693_v38 = vsub.s32 %v1113_v24, %v1093_v8 }
 0x134   : > { %563 = vmin.xlane.f32.xlu1 %v506_v39  ;;  %577 = vmin.xlane.f32.xlu0 %v535_v37  ;;  %v644_v37 = vsub.s32 %v641_v23, %v1093_v8 }
 0x135   : > { %v510_v41 = vpop.f32.mrb[8].mxu0  ;;  %v542_v42 = vpop.f32.mrb[8].mxu1 }
 0x136   : > { %v511_v43 = vadd.f32 %v828_v16, %v510_v41  ;;  %v512_v44 = vpop.f32.mrb[9].mxu0  ;;  %v544_v45 = vpop.f32.mrb[9].mxu1  ;;  %v543_v61 = vadd.f32 %v828_v16, %v542_v42  ;;  %v700_v41 = vsub.s32 %v1117_v27, %v1093_v8  ;;  %v651_v42 = vsub.s32 %v648_v28, %v1093_v8 }
 0x137   : > { %v513_v46 = vpop.f32.mrb[10].mxu0  ;;  %v545_v47 = vpop.f32.mrb[10].mxu1 }
 0x138   : > { %v515_v48 = vpop.f32.mrb[11].mxu0  ;;  %579 = vmin.xlane.f32.xlu1 %v538_v40  ;;  %565 = vmin.xlane.f32.xlu0 %v511_v43  ;;  %v547_v49 = vpop.f32.mrb[11].mxu1  ;;  %v514_v50 = vadd.f32 %v828_v16, %v513_v46  ;;  %v546_v62 = vadd.f32 %v828_v16, %v545_v47  ;;  %v1132_v43 = vadd.s32 4294967240, %v1091_v5  ;;  %v658_v46 = vsub.s32 %v655_v33, %v1093_v8 }
 0x13c   : > { %567 = vmin.xlane.f32.xlu1 %v514_v50 }
 0x13d   : > { %v518_v51 = vpop.f32.mrb[12].mxu0  ;;  %v550_v52 = vpop.f32.mrb[12].mxu1 }
 0x13e   : > { %v519_v53 = vadd.f32 %v828_v16, %v518_v51  ;;  %v520_v54 = vpop.f32.mrb[13].mxu0  ;;  %v552_v55 = vpop.f32.mrb[13].mxu1  ;;  %v551_v63 = vadd.f32 %v828_v16, %v550_v52  ;;  %v665_v51 = vsub.s32 %v1123_v36, %v1093_v8 }
 0x13f   : > { %v521_v56 = vpop.f32.mrb[14].mxu0  ;;  %v553_v57 = vpop.f32.mrb[14].mxu1  ;;  %v1140_v55 = vadd.s32 4294967200, %v1091_v5 }
 0x140   : > { %v522_v58 = vadd.f32 %v828_v16, %v521_v56  ;;  %v523_v59 = vpop.f32.mrb[15].mxu0  ;;  %569 = vmin.xlane.f32.xlu0 %v519_v53  ;;  %v555_v60 = vpop.f32.mrb[15].mxu1  ;;  %v554_v0 = vadd.f32 %v828_v16, %v553_v57 }
 0x141   : > { %v1145_v59 = vadd.s32 4294967192, %v1091_v5 }
 0x142   : > { %571 = vmin.xlane.f32.xlu1 %v522_v58  ;;  %v672_v58 = vsub.s32 %v1132_v43, %v1093_v8  ;;  %v725_v43 = vadd.s32 4294967176, %v1091_v5 }
 0x143   : > { %v714_v15 = vsub.s32 %v1145_v59, %v1093_v8 }
 0x144   : > { %581 = vmin.xlane.f32.xlu0 %v543_v61 }
 0x146   : > { %583 = vmin.xlane.f32.xlu1 %v546_v62 }
 0x148   : > { %585 = vmin.xlane.f32.xlu0 %v551_v63 }
 0x14a   : > { %587 = vmin.xlane.f32.xlu1 %v554_v0 }
 0x1b5   : > { %v558_v1 = vpop.xlane.xlu0 %557 }
 0x1b6   : > { %v881_v12 = vtrunc.f32 %v558_v1 }
 0x1b7   : > { %v1087_v2 = vpop.xlane.xlu1 %575 }
 0x1b8   : > { %v882_v25 = vcvt.f32.s32 %v881_v12  ;;  %v899_v52 = vtrunc.f32 %v1087_v2  ;;  %v707_v12 = vsub.s32 %v1140_v55, %v1093_v8 }
 0x1b9   : > { %v1089_v4 = vpop.xlane.xlu0 %573 }
 0x1ba   : > { %v605_v40 = vand.u32 127, %v882_v25  ;;  %v897_v53 = vtrunc.f32 %v1089_v4  ;;  %v900_v4 = vcvt.f32.s32 %v899_v52 }
 0x1bc   : > { %v626_v56 = vrot.slane %v605_v40, %v625_v18 }
 0x1bd   : > { %v562_v6 = vpop.xlane.xlu1 %561  ;;  %v560_v7 = vpop.xlane.xlu0 %559 }
 0x1be   : > { %v883_v9 = vtrunc.f32 %v560_v7  ;;  %v885_v14 = vtrunc.f32 %v562_v6  ;;  %v898_v6 = vcvt.f32.s32 %v897_v53 }
 0x1c0   : > { %v884_v19 = vcvt.f32.s32 %v883_v9  ;;  %v886_v29 = vcvt.f32.s32 %v885_v14 }
 0x1c1   : > { %v564_v16 = vpop.xlane.xlu1 %563  ;;  %v1103_v17 = vpop.xlane.xlu0 %577 }
 0x1c2   : > { %v887_v20 = vtrunc.f32 %v564_v16  ;;  %v606_v34 = vand.u32 127, %v884_v19  ;;  %v607_v44 = vand.u32 127, %v886_v29  ;;  %v901_v61 = vtrunc.f32 %v1103_v17 }
 0x1c3   : > { %v718_v16 = vadd.s32 4294967184, %v1091_v5 }
 0x1c4   : > { %v888_v35 = vcvt.f32.s32 %v887_v20  ;;  %v631_v48 = vrot.slane %v606_v34, %v630_v30  ;;  %v638_v60 = vrot.slane %v607_v44, %v637_v26  ;;  %v902_v18 = vcvt.f32.s32 %v901_v61 }
 0x1c5   : > { %v580_v31 = vpop.xlane.xlu1 %579  ;;  %v566_v32 = vpop.xlane.xlu0 %565  ;;  %v614_v30 = vand.u32 127, %v900_v4 }
 0x1c6   : > { %v889_v39 = vtrunc.f32 %v566_v32  ;;  %v608_v49 = vand.u32 127, %v888_v35  ;;  %v903_v62 = vtrunc.f32 %v580_v31  ;;  %v633_v0 = vsel %vm632_vm0, %v631_v48, %v626_v56 }
 0x1c7   : > { %v640_v17 = vsel %vm639_vm1, %v638_v60, %v633_v0  ;;  %v613_v31 = vand.u32 127, %v898_v6  ;;  %v687_v53 = vrot.slane %v614_v30, %v686_v21  ;;  %v728_v21 = vsub.s32 %v725_v43, %v1093_v8 }
 0x1c8   : > { %v890_v45 = vcvt.f32.s32 %v889_v39  ;;  %v645_v1 = vrot.slane %v608_v49, %v644_v37  ;;  %v904_v19 = vcvt.f32.s32 %v903_v62  ;;  %v615_v39 = vand.u32 127, %v902_v18 }
 0x1c9   : > { %v568_v47 = vpop.xlane.xlu1 %567  ;;  %v680_v48 = vrot.slane %v613_v31, %v679_v22 }
 0x1ca   : > { %v891_v50 = vtrunc.f32 %v568_v47  ;;  %v609_v54 = vand.u32 127, %v890_v45  ;;  %v647_v25 = vsel %vm646_vm2, %v645_v1, %v640_v17  ;;  %v616_v44 = vand.u32 127, %v904_v19 }
 0x1cb   : > { %v694_v56 = vrot.slane %v615_v39, %v693_v38 }
 0x1cc   : > { %v892_v57 = vcvt.f32.s32 %v891_v50  ;;  %v652_v7 = vrot.slane %v609_v54, %v651_v42  ;;  %v721_v50 = vsub.s32 %v718_v16, %v1093_v8 }
 0x1cd   : > { %v570_v63 = vpop.xlane.xlu0 %569 }
 0x1ce   : > { %v610_v2 = vand.u32 127, %v892_v57  ;;  %v893_v3 = vtrunc.f32 %v570_v63  ;;  %v654_v32 = vsel %vm653_vm3, %v652_v7, %v647_v25  ;;  %v701_v57 = vrot.slane %v616_v44, %v700_v41 }
 0x1cf   : > { %v572_v9 = vpop.xlane.xlu1 %571 }
 0x1d0   : > { %v894_v13 = vcvt.f32.s32 %v893_v3  ;;  %v895_v14 = vtrunc.f32 %v572_v9  ;;  %v659_v20 = vrot.slane %v610_v2, %v658_v46 }
 0x1d1   : > { %v582_v23 = vpop.xlane.xlu0 %581 }
 0x1d2   : > { %v611_v26 = vand.u32 127, %v894_v13  ;;  %v896_v28 = vcvt.f32.s32 %v895_v14  ;;  %v905_v29 = vtrunc.f32 %v582_v23  ;;  %v661_v40 = vsel %vm660_vm4, %v659_v20, %v654_v32 }
 0x1d3   : > { %v584_v33 = vpop.xlane.xlu1 %583 }
 0x1d4   : > { %v666_v34 = vrot.slane %v611_v26, %v665_v51  ;;  %v612_v35 = vand.u32 127, %v896_v28  ;;  %v906_v36 = vcvt.f32.s32 %v905_v29  ;;  %v907_v37 = vtrunc.f32 %v584_v33 }
 0x1d5   : > { %v586_v42 = vpop.xlane.xlu0 %585 }
 0x1d6   : > { %v668_v45 = vsel %vm667_vm5, %v666_v34, %v661_v40  ;;  %v673_v46 = vrot.slane %v612_v35, %v672_v58  ;;  %v908_v47 = vcvt.f32.s32 %v907_v37  ;;  %v617_v49 = vand.u32 127, %v906_v36 }
 0x1d7   : > { %v909_v51 = vtrunc.f32 %v586_v42  ;;  %v588_v52 = vpop.xlane.xlu1 %587 }
 0x1d8   : > { %v675_v5 = vsel %vm674_vm6, %v673_v46, %v668_v45  ;;  %v618_v54 = vand.u32 127, %v908_v47  ;;  %v911_v55 = vtrunc.f32 %v588_v52  ;;  %v708_v60 = vrot.slane %v617_v49, %v707_v12 }
 0x1d9   : > { %v682_v11 = vsel %vm681_vm7, %v680_v48, %v675_v5  ;;  %v910_v22 = vcvt.f32.s32 %v909_v51 }
 0x1da   : > { %v689_v10 = vsel %vm688_vm8, %v687_v53, %v682_v11  ;;  %v912_v58 = vcvt.f32.s32 %v911_v55  ;;  %v715_v61 = vrot.slane %v618_v54, %v714_v15 }
 0x1db   : > { %v696_v59 = vsel %vm695_vm9, %v694_v56, %v689_v10  ;;  %v619_v24 = vand.u32 127, %v910_v22 }
 0x1dc   : > { %v703_v38 = vsel %vm702_vm10, %v701_v57, %v696_v59  ;;  %v620_v62 = vand.u32 127, %v912_v58 }
 0x1dd   : > { %v710_v63 = vsel %vm709_vm11, %v708_v60, %v703_v38  ;;  %v722_v0 = vrot.slane %v619_v24, %v721_v50 }
 0x1de   : > { %v717_v27 = vsel %vm716_vm12, %v715_v61, %v710_v63  ;;  %v729_v8 = vrot.slane %v620_v62, %v728_v21 }
 0x1df   : > { %v724_v41 = vsel %vm723_vm13, %v722_v0, %v717_v27 }
 0x1e0   : > { %v731_v1 = vsel %vm730_vm14, %v729_v8, %v724_v41 }
 0x1e1   : > { %732 = vst [vmem:[%s225_s27] sm:$0x1] %v731_v1 }
 0x1e2 PF: > { %s13_s14 = sadd.s32 1, %s983_s14   ;;  %s1196_s12 = smov %s979_s13 }
 0x1e3   : > { %p10_p5 = scmp.ge.s32.totalorder %s13_s14, 4   ;;  %s1197_s13 = smov %s1199_s15 }
 0x1e5   :  { %12 = sbr.rel (!%p10_p5) target bundleno = 2 (0x2), region = 65 }

</bundles_post_ra>
